<compile_context>
chip_gen: v7x
topology: tpu7x:2x2x1
jax: 0.10.0
libtpu: 0.0.40
codegen_flags: <defaults>
</compile_context>

<pallas_src>
import functools

import jax
import jax.numpy as jnp
from jax import lax
from jax.experimental import pallas as pl
from jax.experimental.pallas import tpu as pltpu


_MAX_ROW_TILE = 4096
_MAX_FULL_C = 4096           # below this, keep the whole class axis in one block
_C_CHUNK = 2048              # class chunk (multiple of 128) for large vocabularies
_TARGET_STEP_BYTES = 8 * 1024 * 1024   # aim for ~8 MiB of logits per grid step


def _vmem_budget_bytes():
    """Generation-aware scoped-VMEM request (~3/4 of physical per-core VMEM)."""
    cap = None
    try:
        cap = int(pltpu.get_tpu_info().vmem_capacity_bytes)
    except Exception:
        cap = None
    if not cap or cap <= 0:
        cap = 64 * 1024 * 1024          # conservative fallback (v7x per-TC size)
    return min((cap * 3) // 4, 100 * 1024 * 1024)


_VMEM_BUDGET = _vmem_budget_bytes()


def _round_up(x, m):
    return ((x + m - 1) // m) * m


def _choose_blocks(n_rows, n_classes, in_itemsize, vmem_budget,
                   block_rows=None, block_classes=None):
    """Pick (row_tile, class_block) sized for big DMAs within the VMEM budget."""
    # --- class (lane) block ---
    if block_classes is not None:
        c_blk = int(block_classes)
        assert c_blk == n_classes or c_blk % 128 == 0, "class block must be C or k*128"
    elif n_classes <= _MAX_FULL_C:
        c_blk = n_classes
    else:
        c_blk = _C_CHUNK

    # --- row (sublane) block ---
    if block_rows is not None:
        tile = int(block_rows)
        assert tile % 8 == 0 and tile > 0, "row block must be a positive multiple of 8"
        return tile, c_blk

    # Per row: 2 double-buffered input copies (input dtype) + ~4 f32-wide per-chunk
    # temporaries (cast, exp, select, ...) live inside the kernel body.
    bytes_per_row = c_blk * (2 * in_itemsize + 4 * 4) + 64
    usable = (vmem_budget * 3) // 4
    vmem_rows = max(8, usable // bytes_per_row)
    target_rows = max(8, _TARGET_STEP_BYTES // (c_blk * in_itemsize))
    tile = min(int(vmem_rows), int(target_rows), _MAX_ROW_TILE,
               _round_up(n_rows, 8))          # don't blow tiny problems up
    tile = max(8, (tile // 8) * 8)
    return tile, c_blk


def _ls_ce_kernel(logits_ref, tgt_ref, nll_ref, smooth_ref,
                  m_ref, s_ref, xsum_ref, xtgt_ref, *,
                  padding_idx: int, num_classes: int, num_rows: int,
                  row_tile: int, c_blk: int, mask_c: bool):
    """One grid step: online logsumexp over one (row_tile, c_blk) class chunk."""
    i = pl.program_id(0)          # row-tile index ("parallel")
    j = pl.program_id(1)          # class-chunk index ("arbitrary", innermost)
    nj = pl.num_programs(1)

    @pl.when(j == 0)
    def _():
        m_ref[...] = jnp.full_like(m_ref, -jnp.inf)
        s_ref[...] = jnp.zeros_like(s_ref)
        xsum_ref[...] = jnp.zeros_like(xsum_ref)
        xtgt_ref[...] = jnp.zeros_like(xtgt_ref)

    x = logits_ref[...].astype(jnp.float32)                 # (tile, c_blk)
    tgt = tgt_ref[...]                                      # (tile, 1) int32

    # Small hoisted class-id iota, compared against (tgt - chunk offset).
    col = lax.broadcasted_iota(jnp.int32, (1, c_blk), 1)    # (1, c_blk)

    if mask_c:
        # Ragged last class block: out-of-range lanes must contribute nothing.
        valid = (col + j * c_blk) < num_classes             # (1, c_blk)
        x = jnp.where(valid, x, -jnp.inf)

    # Online logsumexp update.
    m_prev = m_ref[...]                                     # (tile, 1)
    m_new = jnp.maximum(m_prev, jnp.max(x, axis=-1, keepdims=True))
    e = jnp.exp(x - m_new)                                  # exp(-inf) = 0 on masked lanes
    scale = jnp.exp(m_prev - m_new)
    s_ref[...] = s_ref[...] * scale + jnp.sum(e, axis=-1, keepdims=True)
    m_ref[...] = m_new

    # Running sum(x) (for smooth) and target-masked sum (for nll).
    if mask_c:
        x0 = jnp.where(valid, x, 0.0)
    else:
        x0 = x
    xsum_ref[...] += jnp.sum(x0, axis=-1, keepdims=True)

    tgt_local = tgt - j * c_blk                             # (tile, 1)
    hit = col == tgt_local                                  # (tile, c_blk) via broadcast
    xtgt_ref[...] += jnp.sum(jnp.where(hit, x, 0.0), axis=-1, keepdims=True)

    @pl.when(j == nj - 1)
    def _():
        lse = m_ref[...] + jnp.log(s_ref[...])              # (tile, 1)
        nll = lse - xtgt_ref[...]
        smooth = float(num_classes) * lse - xsum_ref[...]
        row = i * row_tile + lax.broadcasted_iota(jnp.int32, (row_tile, 1), 0)
        keep = (tgt != padding_idx) & (row < num_rows)      # mask padding + ragged tail
        zeros = jnp.zeros_like(nll)
        nll_ref[...] = jnp.where(keep, nll, zeros)
        smooth_ref[...] = jnp.where(keep, smooth, zeros)


@functools.partial(
    jax.jit,
    static_argnames=("padding_idx", "eps", "block_rows", "block_classes"),
)
def label_smoothed_cross_entropy(logits, targets, *, padding_idx, eps,
                                 block_rows=None, block_classes=None):
    """
    :param logits:  [B, T, C] float (f32 or bf16)
    :param targets: [B, T]    integer
    Returns (loss scalar f32, nll_loss [B*T] f32) matching the PyTorch module.
    """
    B, T, C = logits.shape
    N = B * T

    logits2d = logits.reshape(N, C)                 # no padding: raw [N, C] slab
    targets2d = targets.reshape(N, 1).astype(jnp.int32)

    itemsize = jnp.dtype(logits.dtype).itemsize
    tile, c_blk = _choose_blocks(N, C, itemsize, _VMEM_BUDGET,
                                 block_rows=block_rows, block_classes=block_classes)
    n_row_tiles = pl.cdiv(N, tile)
    n_c_blocks = pl.cdiv(C, c_blk)
    mask_c = (C % c_blk) != 0

    kernel = functools.partial(
        _ls_ce_kernel,
        padding_idx=int(padding_idx), num_classes=C, num_rows=N,
        row_tile=tile, c_blk=c_blk, mask_c=mask_c,
    )

    cost = pl.CostEstimate(
        flops=int(9 * N * C),
        transcendentals=int(N * C),
        bytes_accessed=int(N * C * itemsize + 12 * N),
    )

    nll_col, smooth_col = pl.pallas_call(
        kernel,
        out_shape=(
            jax.ShapeDtypeStruct((N, 1), jnp.float32),
            jax.ShapeDtypeStruct((N, 1), jnp.float32),
        ),
        grid_spec=pltpu.PrefetchScalarGridSpec(
            num_scalar_prefetch=0,
            grid=(n_row_tiles, n_c_blocks),
            in_specs=[
                pl.BlockSpec((tile, c_blk), lambda i, j: (i, j)),
                pl.BlockSpec((tile, 1), lambda i, j: (i, 0)),
            ],
            out_specs=[
                pl.BlockSpec((tile, 1), lambda i, j: (i, 0)),
                pl.BlockSpec((tile, 1), lambda i, j: (i, 0)),
            ],
            scratch_shapes=[pltpu.VMEM((tile, 1), jnp.float32)] * 4,
        ),
        compiler_params=pltpu.CompilerParams(
            # Row axis has no carried state -> shards across TensorCores on v7x;
            # class axis carries the online-logsumexp scratch -> "arbitrary".
            dimension_semantics=("parallel", "arbitrary"),
            vmem_limit_bytes=_VMEM_BUDGET,
        ),
        cost_estimate=cost,
    )(logits2d, targets2d)

    nll = nll_col[:, 0]
    smooth = smooth_col[:, 0]
    # Final scalar reduce in the wrapper (tiny: 2*N floats), same formula as the module.
    loss = (1.0 - eps) * jnp.sum(nll) + (eps / C) * jnp.sum(smooth)
    return loss, nll


class LabelSmoothedCrossEntropyCriterion:
    """JAX/Pallas port of the PyTorch module (forward only)."""

    def __init__(self, label_smoothing):
        self.eps = float(label_smoothing)

    def forward(self, logits, targets, padding_idx, **block_overrides):
        loss, nll_loss = label_smoothed_cross_entropy(
            logits, targets, padding_idx=int(padding_idx), eps=self.eps,
            **block_overrides,
        )
        # TODO(synk): the PyTorch reference reads 'ntokens'/'n_sentences' from an
        # undefined `sample`; we report the equivalents derivable from the inputs.
        logging_output = {
            "loss": loss,
            "nll_loss": nll_loss,
            "n_tokens": jnp.sum(targets != padding_idx),
            "n_sentences": targets.shape[0],
        }
        return logging_output


def _reference(logits, targets, padding_idx, eps):
    """Pure-JAX reference for verification (mirrors the PyTorch module)."""
    B, T, C = logits.shape
    lprobs = jax.nn.log_softmax(logits.astype(jnp.float32), axis=-1).reshape(-1, C)
    tgt = targets.reshape(-1)
    nll = -jnp.take_along_axis(lprobs, tgt[:, None], axis=-1)[:, 0]
    smooth = -jnp.sum(lprobs, axis=-1)
    pad = tgt == padding_idx
    nll = jnp.where(pad, 0.0, nll)
    smooth = jnp.where(pad, 0.0, smooth)
    loss = (1.0 - eps) * jnp.sum(nll) + eps / C * jnp.sum(smooth)
    return loss, nll


def _run_case(key, B, T, C, padding_idx, eps, dtype=jnp.float32, **block_overrides):
    k_logits, k_tgt, k_pad = jax.random.split(key, 3)
    logits = jax.random.normal(k_logits, (B, T, C), dtype=jnp.float32).astype(dtype)
    targets = jax.random.randint(k_tgt, (B, T), 0, C, dtype=jnp.int32)
    pad_mask = jax.random.bernoulli(k_pad, 0.25, (B, T))
    targets = jnp.where(pad_mask, padding_idx, targets)

    crit = LabelSmoothedCrossEntropyCriterion(eps)
    out = crit.forward(logits, targets, padding_idx, **block_overrides)
    jax.block_until_ready(out["loss"])
    jax.block_until_ready(out["nll_loss"])

    ref_loss, ref_nll = _reference(logits, targets, padding_idx, eps)
    assert jnp.allclose(out["loss"], ref_loss, atol=1e-3, rtol=1e-4), (
        out["loss"], ref_loss)
    assert jnp.allclose(out["nll_loss"], ref_nll, atol=1e-3, rtol=1e-4)


if __name__ == "__main__":
    padding_idx = 1
    eps = 0.1
    key = jax.random.PRNGKey(0)
    k1, k2, k3 = jax.random.split(key, 3)

    # Small shape implied by the module: B=2, T=8, C=32 (single block, auto tiling).
    _run_case(k1, B=2, T=8, C=32, padding_idx=padding_idx, eps=eps)

    # Exercise ragged row tail (N=148 not a multiple of the 64-row block), multiple
    # row tiles, multiple class chunks, and a ragged/masked last class chunk (C=200
    # with 128-lane chunks) -- no padding of the logits slab anywhere.
    _run_case(k2, B=4, T=37, C=200, padding_idx=padding_idx, eps=eps,
              block_rows=64, block_classes=128)

    # bf16 fast path (halves HBM traffic; math still f32 in-kernel).
    _run_case(k3, B=2, T=24, C=192, padding_idx=padding_idx, eps=eps,
              dtype=jnp.bfloat16)

    print("KERNEL_OK")
</pallas_src>

<mosaic_0001>
module attributes {stable_mosaic.version = 11 : i64} {
  func.func @_ls_ce_kernel(%arg0: i32, %arg1: i32, %arg2: memref<16x32xf32, #tpu.memory_space<vmem>>, %arg3: memref<16x1xi32, #tpu.memory_space<vmem>>, %arg4: memref<16x1xf32, #tpu.memory_space<vmem>>, %arg5: memref<16x1xf32, #tpu.memory_space<vmem>>, %arg6: memref<16x1xf32, #tpu.memory_space<vmem>>, %arg7: memref<16x1xf32, #tpu.memory_space<vmem>>, %arg8: memref<16x1xf32, #tpu.memory_space<vmem>>, %arg9: memref<16x1xf32, #tpu.memory_space<vmem>>) attributes {dimension_semantics = [#tpu.dimension_semantics<parallel>, #tpu.dimension_semantics<arbitrary>], iteration_bounds = array<i64: 1, 1>, scalar_prefetch = 0 : i64, scratch_operands = 4 : i64, tpu.core_type = #tpu.core_type<tc>, window_params = [{transform_indices = @transform_0, window_bounds = array<i64: 16, 32>}, {transform_indices = @transform_1, window_bounds = array<i64: 16, 1>}, {transform_indices = @transform_2, window_bounds = array<i64: 16, 1>}, {transform_indices = @transform_3, window_bounds = array<i64: 16, 1>}]} {
    %c0_i32 = arith.constant 0 : i32
    %0 = arith.cmpi eq, %arg1, %c0_i32 : i32
    %1 = arith.extui %0 : i1 to i32
    %c0_i32_0 = arith.constant 0 : i32
    %2 = arith.cmpi ne, %1, %c0_i32_0 : i32
    scf.if %2 {
      %cst_26 = arith.constant 0xFF800000 : f32
      %43 = vector.broadcast %cst_26 : f32 to vector<16x1xf32>
      %c0_27 = arith.constant 0 : index
      %c0_28 = arith.constant 0 : index
      %44 = vector.load %arg6[%c0_27, %c0_28] : memref<16x1xf32, #tpu.memory_space<vmem>>, vector<16x1xf32>
      tpu.vector_store %arg6[%c0_27, %c0_28], %43 {strides = array<i32>} : memref<16x1xf32, #tpu.memory_space<vmem>>, vector<16x1xf32>,
      %cst_29 = arith.constant 0.000000e+00 : f32
      %45 = vector.broadcast %cst_29 : f32 to vector<16x1xf32>
      %c0_30 = arith.constant 0 : index
      %c0_31 = arith.constant 0 : index
      %46 = vector.load %arg7[%c0_30, %c0_31] : memref<16x1xf32, #tpu.memory_space<vmem>>, vector<16x1xf32>
      tpu.vector_store %arg7[%c0_30, %c0_31], %45 {strides = array<i32>} : memref<16x1xf32, #tpu.memory_space<vmem>>, vector<16x1xf32>,
      %cst_32 = arith.constant 0.000000e+00 : f32
      %47 = vector.broadcast %cst_32 : f32 to vector<16x1xf32>
      %c0_33 = arith.constant 0 : index
      %c0_34 = arith.constant 0 : index
      %48 = vector.load %arg8[%c0_33, %c0_34] : memref<16x1xf32, #tpu.memory_space<vmem>>, vector<16x1xf32>
      tpu.vector_store %arg8[%c0_33, %c0_34], %47 {strides = array<i32>} : memref<16x1xf32, #tpu.memory_space<vmem>>, vector<16x1xf32>,
      %cst_35 = arith.constant 0.000000e+00 : f32
      %49 = vector.broadcast %cst_35 : f32 to vector<16x1xf32>
      %c0_36 = arith.constant 0 : index
      %c0_37 = arith.constant 0 : index
      %50 = vector.load %arg9[%c0_36, %c0_37] : memref<16x1xf32, #tpu.memory_space<vmem>>, vector<16x1xf32>
      tpu.vector_store %arg9[%c0_36, %c0_37], %49 {strides = array<i32>} : memref<16x1xf32, #tpu.memory_space<vmem>>, vector<16x1xf32>,
    } else {
    }
    %c0 = arith.constant 0 : index
    %c0_1 = arith.constant 0 : index
    %3 = vector.load %arg2[%c0, %c0_1] : memref<16x32xf32, #tpu.memory_space<vmem>>, vector<16x32xf32>
    %c0_2 = arith.constant 0 : index
    %c0_3 = arith.constant 0 : index
    %4 = vector.load %arg3[%c0_2, %c0_3] : memref<16x1xi32, #tpu.memory_space<vmem>>, vector<16x1xi32>
    %5 = tpu.iota {dimensions = array<i32: 1>} : vector<1x32xi32>
    %c0_4 = arith.constant 0 : index
    %c0_5 = arith.constant 0 : index
    %6 = vector.load %arg6[%c0_4, %c0_5] : memref<16x1xf32, #tpu.memory_space<vmem>>, vector<16x1xf32>
    %cst = arith.constant dense<0xFF800000> : vector<16xf32>
    %7 = vector.multi_reduction <maximumf>, %3, %cst [1] : vector<16x32xf32> to vector<16xf32>
    %8 = vector.shape_cast %7 : vector<16xf32> to vector<16x1xf32>
    %9 = arith.maximumf %6, %8 : vector<16x1xf32>
    %10 = vector.broadcast %9 : vector<16x1xf32> to vector<16x32xf32>
    %11 = arith.subf %3, %10 : vector<16x32xf32>
    %12 = math.exp %11 : vector<16x32xf32>
    %13 = arith.subf %6, %9 : vector<16x1xf32>
    %14 = math.exp %13 : vector<16x1xf32>
    %c0_6 = arith.constant 0 : index
    %c0_7 = arith.constant 0 : index
    %15 = vector.load %arg7[%c0_6, %c0_7] : memref<16x1xf32, #tpu.memory_space<vmem>>, vector<16x1xf32>
    %16 = arith.mulf %15, %14 : vector<16x1xf32>
    %cst_8 = arith.constant dense<0.000000e+00> : vector<16xf32>
    %17 = vector.multi_reduction <add>, %12, %cst_8 [1] : vector<16x32xf32> to vector<16xf32>
    %18 = vector.shape_cast %17 : vector<16xf32> to vector<16x1xf32>
    %19 = arith.addf %16, %18 : vector<16x1xf32>
    %c0_9 = arith.constant 0 : index
    %c0_10 = arith.constant 0 : index
    %20 = vector.load %arg7[%c0_9, %c0_10] : memref<16x1xf32, #tpu.memory_space<vmem>>, vector<16x1xf32>
    tpu.vector_store %arg7[%c0_9, %c0_10], %19 {strides = array<i32>} : memref<16x1xf32, #tpu.memory_space<vmem>>, vector<16x1xf32>,
    %c0_11 = arith.constant 0 : index
    %c0_12 = arith.constant 0 : index
    %21 = vector.load %arg6[%c0_11, %c0_12] : memref<16x1xf32, #tpu.memory_space<vmem>>, vector<16x1xf32>
    tpu.vector_store %arg6[%c0_11, %c0_12], %9 {strides = array<i32>} : memref<16x1xf32, #tpu.memory_space<vmem>>, vector<16x1xf32>,
    %c0_13 = arith.constant 0 : index
    %c0_14 = arith.constant 0 : index
    %22 = vector.load %arg8[%c0_13, %c0_14] : memref<16x1xf32, #tpu.memory_space<vmem>>, vector<16x1xf32>
    %cst_15 = arith.constant dense<0.000000e+00> : vector<16xf32>
    %23 = vector.multi_reduction <add>, %3, %cst_15 [1] : vector<16x32xf32> to vector<16xf32>
    %24 = vector.shape_cast %23 : vector<16xf32> to vector<16x1xf32>
    %25 = arith.addf %22, %24 : vector<16x1xf32>
    %c0_16 = arith.constant 0 : index
    %c0_17 = arith.constant 0 : index
    %26 = vector.load %arg8[%c0_16, %c0_17] : memref<16x1xf32, #tpu.memory_space<vmem>>, vector<16x1xf32>
    tpu.vector_store %arg8[%c0_16, %c0_17], %25 {strides = array<i32>} : memref<16x1xf32, #tpu.memory_space<vmem>>, vector<16x1xf32>,
    %c32_i32 = arith.constant 32 : i32
    %27 = arith.muli %arg1, %c32_i32 : i32
    %28 = vector.broadcast %27 : i32 to vector<16x1xi32>
    %29 = arith.subi %4, %28 : vector<16x1xi32>
    %30 = vector.broadcast %5 : vector<1x32xi32> to vector<16x32xi32>
    %31 = vector.broadcast %29 : vector<16x1xi32> to vector<16x32xi32>
    %32 = arith.cmpi eq, %30, %31 : vector<16x32xi32>
    %c0_18 = arith.constant 0 : index
    %c0_19 = arith.constant 0 : index
    %33 = vector.load %arg9[%c0_18, %c0_19] : memref<16x1xf32, #tpu.memory_space<vmem>>, vector<16x1xf32>
    %cst_20 = arith.constant 0.000000e+00 : f32
    %34 = vector.broadcast %cst_20 : f32 to vector<16x32xf32>
    %35 = arith.select %32, %3, %34 : vector<16x32xi1>, vector<16x32xf32>
    %cst_21 = arith.constant dense<0.000000e+00> : vector<16xf32>
    %36 = vector.multi_reduction <add>, %35, %cst_21 [1] : vector<16x32xf32> to vector<16xf32>
    %37 = vector.shape_cast %36 : vector<16xf32> to vector<16x1xf32>
    %38 = arith.addf %33, %37 : vector<16x1xf32>
    %c0_22 = arith.constant 0 : index
    %c0_23 = arith.constant 0 : index
    %39 = vector.load %arg9[%c0_22, %c0_23] : memref<16x1xf32, #tpu.memory_space<vmem>>, vector<16x1xf32>
    tpu.vector_store %arg9[%c0_22, %c0_23], %38 {strides = array<i32>} : memref<16x1xf32, #tpu.memory_space<vmem>>, vector<16x1xf32>,
    %c0_i32_24 = arith.constant 0 : i32
    %40 = arith.cmpi eq, %arg1, %c0_i32_24 : i32
    %41 = arith.extui %40 : i1 to i32
    %c0_i32_25 = arith.constant 0 : i32
    %42 = arith.cmpi ne, %41, %c0_i32_25 : i32
    scf.if %42 {
      %c0_26 = arith.constant 0 : index
      %c0_27 = arith.constant 0 : index
      %43 = vector.load %arg6[%c0_26, %c0_27] : memref<16x1xf32, #tpu.memory_space<vmem>>, vector<16x1xf32>
      %c0_28 = arith.constant 0 : index
      %c0_29 = arith.constant 0 : index
      %44 = vector.load %arg7[%c0_28, %c0_29] : memref<16x1xf32, #tpu.memory_space<vmem>>, vector<16x1xf32>
      %45 = math.log %44 : vector<16x1xf32>
      %46 = arith.addf %43, %45 : vector<16x1xf32>
      %c0_30 = arith.constant 0 : index
      %c0_31 = arith.constant 0 : index
      %47 = vector.load %arg9[%c0_30, %c0_31] : memref<16x1xf32, #tpu.memory_space<vmem>>, vector<16x1xf32>
      %48 = arith.subf %46, %47 : vector<16x1xf32>
      %cst_32 = arith.constant 3.200000e+01 : f32
      %49 = vector.broadcast %cst_32 : f32 to vector<16x1xf32>
      %50 = arith.mulf %49, %46 : vector<16x1xf32>
      %c0_33 = arith.constant 0 : index
      %c0_34 = arith.constant 0 : index
      %51 = vector.load %arg8[%c0_33, %c0_34] : memref<16x1xf32, #tpu.memory_space<vmem>>, vector<16x1xf32>
      %52 = arith.subf %50, %51 : vector<16x1xf32>
      %c16_i32 = arith.constant 16 : i32
      %53 = arith.muli %arg0, %c16_i32 : i32
      %54 = tpu.iota {dimensions = array<i32: 0>} : vector<16x1xi32>
      %55 = vector.broadcast %53 : i32 to vector<16x1xi32>
      %56 = arith.addi %55, %54 : vector<16x1xi32>
      %c1_i32 = arith.constant 1 : i32
      %57 = vector.broadcast %c1_i32 : i32 to vector<16x1xi32>
      %58 = arith.cmpi ne, %4, %57 : vector<16x1xi32>
      %c16_i32_35 = arith.constant 16 : i32
      %59 = vector.broadcast %c16_i32_35 : i32 to vector<16x1xi32>
      %60 = arith.cmpi slt, %56, %59 : vector<16x1xi32>
      %61 = arith.andi %58, %60 : vector<16x1xi1>
      %cst_36 = arith.constant 0.000000e+00 : f32
      %62 = vector.broadcast %cst_36 : f32 to vector<16x1xf32>
      %63 = arith.select %61, %48, %62 : vector<16x1xi1>, vector<16x1xf32>
      %c0_37 = arith.constant 0 : index
      %c0_38 = arith.constant 0 : index
      %64 = vector.load %arg4[%c0_37, %c0_38] : memref<16x1xf32, #tpu.memory_space<vmem>>, vector<16x1xf32>
      tpu.vector_store %arg4[%c0_37, %c0_38], %63 {strides = array<i32>} : memref<16x1xf32, #tpu.memory_space<vmem>>, vector<16x1xf32>,
      %65 = arith.select %61, %52, %62 : vector<16x1xi1>, vector<16x1xf32>
      %c0_39 = arith.constant 0 : index
      %c0_40 = arith.constant 0 : index
      %66 = vector.load %arg5[%c0_39, %c0_40] : memref<16x1xf32, #tpu.memory_space<vmem>>, vector<16x1xf32>
      tpu.vector_store %arg5[%c0_39, %c0_40], %65 {strides = array<i32>} : memref<16x1xf32, #tpu.memory_space<vmem>>, vector<16x1xf32>,
    } else {
    }
    return
  }
  func.func @transform_0(%arg0: i32, %arg1: i32) -> (i32, i32) {
    %c0_i32 = arith.constant 0 : i32
    return %arg0, %arg1 : i32, i32
  }
  func.func @transform_1(%arg0: i32, %arg1: i32) -> (i32, i32) {
    %c0_i32 = arith.constant 0 : i32
    %c0_i32_0 = arith.constant 0 : i32
    return %arg0, %c0_i32 : i32, i32
  }
  func.func @transform_2(%arg0: i32, %arg1: i32) -> (i32, i32) {
    %c0_i32 = arith.constant 0 : i32
    %c0_i32_0 = arith.constant 0 : i32
    return %arg0, %c0_i32 : i32, i32
  }
  func.func @transform_3(%arg0: i32, %arg1: i32) -> (i32, i32) {
    %c0_i32 = arith.constant 0 : i32
    %c0_i32_0 = arith.constant 0 : i32
    return %arg0, %c0_i32 : i32, i32
  }
}

</mosaic_0001>

<bundles_post_ra>
// kernel: label_smoothed_cross_entropy.1
= control target key start
LH: loop header
LB: loop body
LE: loop exit
PB: predicated region body
PF: predicated region fallthrough
CT: control target
= control target key end

     0   :  { %vm34_vm0 = vcmask 261120   ;;  %vm17_vm1 = vcmask 7168   ;;  %v189_v2 = vmov -inf   ;;  %v190_v5 = vmov 0   ;;  %s276_s0 = inlined_call_operand.vmem [shape: f32[16,32], index: 0, kind: input, shape index: {}]   ;;  %s277_s1 = inlined_call_operand.vmem [shape: s32[16,1], index: 1, kind: input, shape index: {}]   ;;  %s278_s2 = inlined_call_operand.vmem [shape: f32[16,1], index: 2, kind: output, shape index: {0}]   ;;  %s279_s3 = inlined_call_operand.vmem [shape: f32[16,1], index: 3, kind: output, shape index: {1}]  }
   0x1   :  { %v26_v0 = vld [vmem:[%s276_s0] sm:$0xff]  ;;  %v27_v1 = vld [vmem:[%s276_s0 + $0x8] sm:$0xff]  ;;  %18 = vst.msk [vmem:[#allocation2] sm:$0xff] %vm17_vm1, %v189_v2  ;;  %19 = vst.msk [vmem:[#allocation2 + $0x8] sm:$0xff] %vm17_vm1, %v189_v2  ;;  %175 = vset.pattern.permute.xlu1 %v190_v5  ;;  %176 = vset.pattern.permute.xlu0 %v190_v5  ;;  %v191_v6 = vmov 0.0   ;;  %v30_v24 = vlaneseq }
   0x2   :  { %v35_v3 = vsel %vm34_vm0, %v26_v0, -inf  ;;  %v38_v4 = vsel %vm34_vm0, %v27_v1, -inf  ;;  %20 = vst.msk [vmem:[#allocation3] sm:$0xff] %vm17_vm1, %v191_v6  ;;  %21 = vst.msk [vmem:[#allocation3 + $0x8] sm:$0xff] %vm17_vm1, %v191_v6  ;;  %v231_v7 = vld [vmem:[%s277_s1] sm:$0xff]  ;;  %v239_v16 = vld [vmem:[%s277_s1 + $0x8] sm:$0xff] }
   0x3   :  { %36 = vmax.xlane.f32.xlu0 %v35_v3  ;;  %22 = vst.msk [vmem:[#allocation4] sm:$0xff] %vm17_vm1, %v191_v6  ;;  %23 = vst.msk [vmem:[#allocation4 + $0x8] sm:$0xff] %vm17_vm1, %v191_v6  ;;  %v84_v17 = vsel %vm34_vm0, %v26_v0, 0.0  ;;  %v31_v28 = vand.u32 127, %v30_v24  ;;  %v87_v31 = vsel %vm34_vm0, %v27_v1, 0.0  ;;  %vm150_vm4 = vcmp.ne.s32.totalorder %v231_v7, 1 }
   0x4   :  { %24 = vst.msk [vmem:[#allocation5] sm:$0xff] %vm17_vm1, %v191_v6  ;;  %25 = vst.msk [vmem:[#allocation5 + $0x8] sm:$0xff] %vm17_vm1, %v191_v6  ;;  %vm151_vm5 = vcmp.ne.s32.totalorder %v239_v16, 1 }
   0x7   :  { %39 = vmax.xlane.f32.xlu0 %v38_v4 }
   0x8   :  { %v32_v8 = vld [vmem:[#allocation2] sm:$0xff]  ;;  %v33_v11 = vld [vmem:[#allocation2 + $0x8] sm:$0xff] }
   0x9   :  { %v65_v43 = vld [vmem:[#allocation3] sm:$0xff]  ;;  %v66_v47 = vld [vmem:[#allocation3 + $0x8] sm:$0xff] }
   0xa   :  { %v82_v37 = vld [vmem:[#allocation4] sm:$0xff]  ;;  %v83_v52 = vld [vmem:[#allocation4 + $0x8] sm:$0xff] }
   0xb   :  { %v106_v56 = vld [vmem:[#allocation5] sm:$0xff]  ;;  %v107_v60 = vld [vmem:[#allocation5 + $0x8] sm:$0xff] }
  0x1d   :  { %99 = vperm.xlu0 %176, %v231_v7  }
  0x3c   :  { %85 = vadd.xlane.f32.xlu0 %v84_v17 }
  0x90   :  { %v37_v9 = vpop.xlane.xlu0 %36 }
  0x91   :  { %v41_v10 = vmax.f32 %v32_v8, %v37_v9 }
  0x93   :  { %v59_v12 = vsub.f32 %v32_v8, %v41_v10  ;;  %80 = vst.msk [vmem:[#allocation2] sm:$0xff] %vm17_vm1, %v41_v10  ;;  %45 = vperm.xlu1 %175, %v41_v10  }
  0x94   :  { %v40_v13 = vpop.xlane.xlu0 %39 }
  0x95   :  { %v42_v14 = vmax.f32 %v33_v11, %v40_v13  ;;  %v61_v40 = vmul.f32 1.442695, %v59_v12 }
  0x97   :  { %v60_v15 = vsub.f32 %v33_v11, %v42_v14  ;;  %81 = vst.msk [vmem:[#allocation2 + $0x8] sm:$0xff] %vm17_vm1, %v42_v14  ;;  %50 = vperm.xlu1 %175, %v42_v14  }
  0x99   :  { %v63_v41 = vmul.f32 1.442695, %v60_v15 }
  0x9b   :  { %102 = vperm.xlu1 %175, %v239_v16  }
  0x9c   :  { %v100_v27 = vpop.permute.xlu0 %99 }
  0x9d   :  { %vm104_vm2 = vcmp.eq.s32.totalorder %v31_v28, %v100_v27 }
  0x9e   :  { %v108_v33 = vsel %vm104_vm2, %v26_v0, 0.0  ;;  %v124_v10 = vld [vmem:[#allocation2 + $0x8] sm:$0xff] }
  0x9f   :  { %v110_v34 = vsel %vm34_vm0, %v108_v33, 0.0 }
  0xc9   :  { %v86_v38 = vpop.xlane.xlu0 %85 }
  0xca   :  { %v90_v39 = vadd.f32 %v86_v38, %v82_v37 }
  0xcc   :  { %92 = vst.msk [vmem:[#allocation4] sm:$0xff] %vm17_vm1, %v90_v39 }
  0xd3   :  { %v139_v5 = vld [vmem:[#allocation4] sm:$0xff] }
 0x112   :  { %v46_v18 = vpop.permute.xlu1 %45 }
 0x113   :  { %v53_v19 = vsub.f32 %v26_v0, %v46_v18 }
 0x115   :  { %v55_v20 = vmul.f32 1.442695, %v53_v19 }
 0x116   :  { %v51_v21 = vpop.permute.xlu1 %50 }
 0x117   :  { %177 = vpow2.f32 %v55_v20  ;;  %v54_v22 = vsub.f32 %v27_v1, %v51_v21 }
 0x119   :  { %v57_v23 = vmul.f32 1.442695, %v54_v22 }
 0x11a   :  { %v103_v32 = vpop.permute.xlu1 %102 }
 0x11b   :  { %179 = vpow2.f32 %v57_v23  ;;  %vm105_vm3 = vcmp.eq.s32.totalorder %v31_v28, %v103_v32 }
 0x11c   :  { %v109_v35 = vsel %vm105_vm3, %v27_v1, 0.0  ;;  %181 = vpow2.f32 %v61_v40  ;;  %v123_v1 = vld [vmem:[#allocation2] sm:$0xff] }
 0x11d   :  { %v113_v36 = vsel %vm34_vm0, %v109_v35, 0.0  ;;  %183 = vpow2.f32 %v63_v41 }
 0x121   :  { %v178_v25 = vpop.eup %177 }
 0x122   :  { %v69_v26 = vsel %vm34_vm0, %v178_v25, 0.0 }
 0x123   :  { %70 = vadd.xlane.f32.xlu1 %v69_v26 }
 0x125   :  { %v180_v29 = vpop.eup %179 }
 0x126   :  { %v72_v30 = vsel %vm34_vm0, %v180_v29, 0.0  ;;  %v182_v42 = vpop.eup %181 }
 0x127   :  { %73 = vadd.xlane.f32.xlu1 %v72_v30  ;;  %v67_v44 = vmul.f32 %v182_v42, %v65_v43  ;;  %v184_v45 = vpop.eup %183 }
 0x128   :  { %v68_v49 = vmul.f32 %v184_v45, %v66_v47 }
 0x12b   :  { %88 = vadd.xlane.f32.xlu1 %v87_v31 }
 0x12f   :  { %111 = vadd.xlane.f32.xlu1 %v110_v34 }
 0x133   :  { %114 = vadd.xlane.f32.xlu1 %v113_v36 }
 0x1b0   :  { %v71_v46 = vpop.xlane.xlu1 %70 }
 0x1b1   :  { %v75_v48 = vadd.f32 %v71_v46, %v67_v44 }
 0x1b3   :  { %78 = vst.msk [vmem:[#allocation3] sm:$0xff] %vm17_vm1, %v75_v48 }
 0x1b4   :  { %v74_v50 = vpop.xlane.xlu1 %73 }
 0x1b5   :  { %v76_v51 = vadd.f32 %v74_v50, %v68_v49 }
 0x1b7   :  { %79 = vst.msk [vmem:[#allocation3 + $0x8] sm:$0xff] %vm17_vm1, %v76_v51 }
 0x1b8   :  { %v89_v53 = vpop.xlane.xlu1 %88 }
 0x1b9   :  { %v91_v54 = vadd.f32 %v89_v53, %v83_v52 }
 0x1ba   :  { %v125_v55 = vld [vmem:[#allocation3] sm:$0xff] }
 0x1bb   :  { %185 = vlog2.f32 %v125_v55  ;;  %93 = vst.msk [vmem:[#allocation4 + $0x8] sm:$0xff] %vm17_vm1, %v91_v54 }
 0x1bc   :  { %v112_v57 = vpop.xlane.xlu1 %111 }
 0x1bd   :  { %v116_v58 = vadd.f32 %v112_v57, %v106_v56 }
 0x1be   :  { %v126_v59 = vld [vmem:[#allocation3 + $0x8] sm:$0xff] }
 0x1bf   :  { %187 = vlog2.f32 %v126_v59  ;;  %118 = vst.msk [vmem:[#allocation5] sm:$0xff] %vm17_vm1, %v116_v58 }
 0x1c0   :  { %v115_v61 = vpop.xlane.xlu1 %114 }
 0x1c1   :  { %v117_v62 = vadd.f32 %v115_v61, %v107_v60 }
 0x1c2   :  { %v140_v19 = vld [vmem:[#allocation4 + $0x8] sm:$0xff] }
 0x1c3   :  { %119 = vst.msk [vmem:[#allocation5 + $0x8] sm:$0xff] %vm17_vm1, %v117_v62 }
 0x1c5   :  { %v186_v63 = vpop.eup %185 }
 0x1c6   :  { %v128_v0 = vmul.f32 0.6931472, %v186_v63  ;;  %v133_v2 = vld [vmem:[#allocation5] sm:$0xff] }
 0x1c8   :  { %v131_v3 = vadd.f32 %v128_v0, %v123_v1 }
 0x1c9   :  { %v188_v4 = vpop.eup %187 }
 0x1ca   :  { %v130_v6 = vmul.f32 0.6931472, %v188_v4  ;;  %v135_v8 = vsub.f32 %v131_v3, %v133_v2  ;;  %v137_v9 = vmul.f32 32.0, %v131_v3  ;;  %v134_v14 = vld [vmem:[#allocation5 + $0x8] sm:$0xff] }
 0x1cc   :  { %v132_v11 = vadd.f32 %v130_v6, %v124_v10  ;;  %v156_v12 = vsel %vm150_vm4, %v135_v8, 0.0  ;;  %v141_v13 = vsub.f32 %v137_v9, %v139_v5 }
 0x1cd   :  { %158 = vst.msk [vmem:[%s278_s2] sm:$0xff] %vm17_vm1, %v156_v12 }
 0x1ce   :  { %v138_v15 = vmul.f32 32.0, %v132_v11  ;;  %v136_v17 = vsub.f32 %v132_v11, %v134_v14  ;;  %v160_v18 = vsel %vm150_vm4, %v141_v13, 0.0 }
 0x1cf   :  { %162 = vst.msk [vmem:[%s279_s3] sm:$0xff] %vm17_vm1, %v160_v18 }
 0x1d0   :  { %v142_v20 = vsub.f32 %v138_v15, %v140_v19  ;;  %v157_v21 = vsel %vm151_vm5, %v136_v17, 0.0 }
 0x1d1   :  { %159 = vst.msk [vmem:[%s278_s2 + $0x8] sm:$0xff] %vm17_vm1, %v157_v21 }
 0x1d2   :  { %v161_v16 = vsel %vm151_vm5, %v142_v20, 0.0 }
 0x1d3   :  { %163 = vst.msk [vmem:[%s279_s3 + $0x8] sm:$0xff] %vm17_vm1, %v161_v16 }

</bundles_post_ra>
